<compile_context>
chip_gen: v7x
topology: tpu7x:2x2x1
jax: 0.10.0
libtpu: 0.0.40
codegen_flags: <defaults>
</compile_context>

<pallas_src>
import math

import jax
import jax.numpy as jnp
from jax import lax
from jax.experimental import pallas as pl
from jax.experimental.pallas import tpu as pltpu


def _real_number_embedding_kernel(x_ref, w_ref, b_ref, o_ref):
    # x_ref: (R, k)   -- k consecutive scalars folded per row (original dtype)
    # w_ref: (1, k*D) -- weight tiled k times (f32, VMEM-resident across grid)
    # b_ref: (1, k*D) -- bias tiled k times   (f32, VMEM-resident across grid)
    # o_ref: (R, k*D) -- lane-dense output block (k*D is a multiple of 128
    #                    whenever the fold is active)
    R, k = x_ref.shape
    kD = o_ref.shape[-1]
    D = kD // k

    x = x_ref[...].astype(jnp.float32)  # (R, k)

    # Build xb of shape (R, k*D) where column j holds x[:, j // D], using only
    # cheap VPU ops (lane broadcasts + where-selects); exact in f32.
    xb = jnp.broadcast_to(x[:, 0:1], (R, kD))
    if k > 1:
        lane = lax.broadcasted_iota(jnp.int32, (R, kD), 1)
        for g in range(1, k):
            xb = jnp.where(lane >= g * D,
                           jnp.broadcast_to(x[:, g:g + 1], (R, kD)),
                           xb)

    out = xb * w_ref[...] + b_ref[...]
    o_ref[...] = out.astype(o_ref.dtype)


def real_number_embedding(x, weight, bias, *, out_dtype=None,
                          target_tile_bytes=2 * 1024 * 1024):
    """x: any shape of real scalars; weight/bias: (D,). Returns (*x.shape, D)."""
    orig_shape = x.shape
    D = int(weight.shape[0])
    if out_dtype is None:
        # Match the PyTorch module's dtype behavior (promotion of x / params).
        out_dtype = jnp.result_type(x.dtype, weight.dtype, bias.dtype)

    N = math.prod(orig_shape) if orig_shape else 1
    x_flat = x.reshape(N)

    # Lane-dense fold factor: smallest k with (k*D) % 128 == 0, capped so the
    # per-element select chain stays cheap and the kernel stays memory-bound.
    k = 128 // math.gcd(D, 128)
    if k > 8:
        k = 1  # awkward D; fall back (masked stores on the lane remainder).

    pad = (-N) % k
    if pad:
        x_flat = jnp.pad(x_flat, (0, pad))  # at most k-1 scalars
    Np = N + pad
    Nk = Np // k
    kD = k * D

    x2 = x_flat.reshape(Nk, k)  # keep original dtype; cast happens in-kernel
    w2 = jnp.tile(weight.astype(jnp.float32), k).reshape(1, kD)
    b2 = jnp.tile(bias.astype(jnp.float32), k).reshape(1, kD)

    # Row-tile sizing: ~target_tile_bytes per output buffer (double-buffered
    # by the pipeline), rows a multiple of 8 sublanes. Small inputs -> one
    # block equal to the full array (always a legal block shape).
    bytes_per_row = kD * jnp.dtype(out_dtype).itemsize
    rows_cap = max(8, (target_tile_bytes // bytes_per_row) // 8 * 8)
    if Nk <= rows_cap:
        tile_rows = Nk
        grid = (1,)
    else:
        tile_rows = rows_cap
        grid = (pl.cdiv(Nk, tile_rows),)  # partial last block clipped by Pallas

    out2 = pl.pallas_call(
        _real_number_embedding_kernel,
        out_shape=jax.ShapeDtypeStruct((Nk, kD), out_dtype),
        grid_spec=pltpu.PrefetchScalarGridSpec(
            num_scalar_prefetch=0,
            grid=grid,
            in_specs=[
                pl.BlockSpec((tile_rows, k), lambda i: (i, 0)),
                pl.BlockSpec((1, kD), lambda i: (0, 0)),  # weight, VMEM-resident
                pl.BlockSpec((1, kD), lambda i: (0, 0)),  # bias,   VMEM-resident
            ],
            out_specs=pl.BlockSpec((tile_rows, kD), lambda i: (i, 0)),
        ),
        compiler_params=pltpu.CompilerParams(
            dimension_semantics=("parallel",),
            vmem_limit_bytes=32 * 1024 * 1024,
        ),
    )(x2, w2, b2)

    # (Nk, k*D) -> (Np, D) is a row-major-compatible reshape (no data movement).
    out = out2.reshape(Np, D)
    if pad:
        out = out[:N]
    return out.reshape(*orig_shape, D)


if __name__ == "__main__":
    # Deterministic parameter init matching reset_parameters():
    #   weight ~ N(0, 1), bias ~ N(0, 0.1)
    embedding_dim = 32
    B, T = 2, 8

    key = jax.random.PRNGKey(0)
    k_w, k_b, k_x = jax.random.split(key, 3)
    weight = jax.random.normal(k_w, (embedding_dim,), dtype=jnp.float32) * 1.0
    bias = jax.random.normal(k_b, (embedding_dim,), dtype=jnp.float32) * 0.1
    x = jax.random.normal(k_x, (B, T), dtype=jnp.float32)

    out = real_number_embedding(x, weight, bias)
    out = jax.block_until_ready(out)

    # Reference check (plain JAX).
    ref = x[..., None] * weight + bias
    assert out.shape == (B, T, embedding_dim), out.shape
    assert jnp.allclose(out, ref, atol=1e-6, rtol=1e-6), "mismatch vs reference"

    print("KERNEL_OK")
</pallas_src>

<mosaic_0001>
module attributes {stable_mosaic.version = 11 : i64} {
  func.func @_real_number_embedding_kernel(%arg0: i32, %arg1: memref<4x4xf32, #tpu.memory_space<vmem>>, %arg2: memref<1x128xf32, #tpu.memory_space<vmem>>, %arg3: memref<1x128xf32, #tpu.memory_space<vmem>>, %arg4: memref<4x128xf32, #tpu.memory_space<vmem>>) attributes {dimension_semantics = [#tpu.dimension_semantics<parallel>], iteration_bounds = array<i64: 1>, scalar_prefetch = 0 : i64, scratch_operands = 0 : i64, tpu.core_type = #tpu.core_type<tc>, window_params = [{transform_indices = @transform_0, window_bounds = array<i64: 4, 4>}, {pipeline_mode = #tpu.pipeline_mode<synchronous>, transform_indices = @transform_1, window_bounds = array<i64: 1, 128>}, {pipeline_mode = #tpu.pipeline_mode<synchronous>, transform_indices = @transform_2, window_bounds = array<i64: 1, 128>}, {transform_indices = @transform_3, window_bounds = array<i64: 4, 128>}]} {
    %c0 = arith.constant 0 : index
    %c0_0 = arith.constant 0 : index
    %0 = vector.load %arg1[%c0, %c0_0] : memref<4x4xf32, #tpu.memory_space<vmem>>, vector<4x4xf32>
    %1 = vector.extract_strided_slice %0 {offsets = [0, 0], sizes = [4, 1], strides = [1, 1]} : vector<4x4xf32> to vector<4x1xf32>
    %2 = vector.shape_cast %1 : vector<4x1xf32> to vector<4x1xf32>
    %3 = vector.broadcast %2 : vector<4x1xf32> to vector<4x128xf32>
    %4 = tpu.iota {dimensions = array<i32: 1>} : vector<4x128xi32>
    %c32_i32 = arith.constant 32 : i32
    %5 = vector.broadcast %c32_i32 : i32 to vector<4x128xi32>
    %6 = arith.cmpi sge, %4, %5 : vector<4x128xi32>
    %7 = vector.extract_strided_slice %0 {offsets = [0, 1], sizes = [4, 1], strides = [1, 1]} : vector<4x4xf32> to vector<4x1xf32>
    %8 = vector.shape_cast %7 : vector<4x1xf32> to vector<4x1xf32>
    %9 = vector.broadcast %8 : vector<4x1xf32> to vector<4x128xf32>
    %10 = arith.select %6, %9, %3 : vector<4x128xi1>, vector<4x128xf32>
    %c64_i32 = arith.constant 64 : i32
    %11 = vector.broadcast %c64_i32 : i32 to vector<4x128xi32>
    %12 = arith.cmpi sge, %4, %11 : vector<4x128xi32>
    %13 = vector.extract_strided_slice %0 {offsets = [0, 2], sizes = [4, 1], strides = [1, 1]} : vector<4x4xf32> to vector<4x1xf32>
    %14 = vector.shape_cast %13 : vector<4x1xf32> to vector<4x1xf32>
    %15 = vector.broadcast %14 : vector<4x1xf32> to vector<4x128xf32>
    %16 = arith.select %12, %15, %10 : vector<4x128xi1>, vector<4x128xf32>
    %c96_i32 = arith.constant 96 : i32
    %17 = vector.broadcast %c96_i32 : i32 to vector<4x128xi32>
    %18 = arith.cmpi sge, %4, %17 : vector<4x128xi32>
    %19 = vector.extract_strided_slice %0 {offsets = [0, 3], sizes = [4, 1], strides = [1, 1]} : vector<4x4xf32> to vector<4x1xf32>
    %20 = vector.shape_cast %19 : vector<4x1xf32> to vector<4x1xf32>
    %21 = vector.broadcast %20 : vector<4x1xf32> to vector<4x128xf32>
    %22 = arith.select %18, %21, %16 : vector<4x128xi1>, vector<4x128xf32>
    %c0_1 = arith.constant 0 : index
    %c0_2 = arith.constant 0 : index
    %23 = vector.load %arg2[%c0_1, %c0_2] : memref<1x128xf32, #tpu.memory_space<vmem>>, vector<1x128xf32>
    %24 = vector.broadcast %23 : vector<1x128xf32> to vector<4x128xf32>
    %25 = arith.mulf %22, %24 : vector<4x128xf32>
    %c0_3 = arith.constant 0 : index
    %c0_4 = arith.constant 0 : index
    %26 = vector.load %arg3[%c0_3, %c0_4] : memref<1x128xf32, #tpu.memory_space<vmem>>, vector<1x128xf32>
    %27 = vector.broadcast %26 : vector<1x128xf32> to vector<4x128xf32>
    %28 = arith.addf %25, %27 : vector<4x128xf32>
    %c0_5 = arith.constant 0 : index
    %c0_6 = arith.constant 0 : index
    %29 = vector.load %arg4[%c0_5, %c0_6] : memref<4x128xf32, #tpu.memory_space<vmem>>, vector<4x128xf32>
    tpu.vector_store %arg4[%c0_5, %c0_6], %28 {strides = array<i32>} : memref<4x128xf32, #tpu.memory_space<vmem>>, vector<4x128xf32>,
    return
  }
  func.func @transform_0(%arg0: i32) -> (i32, i32) {
    %c0_i32 = arith.constant 0 : i32
    %c0_i32_0 = arith.constant 0 : i32
    return %arg0, %c0_i32 : i32, i32
  }
  func.func @transform_1(%arg0: i32) -> (i32, i32) {
    %c0_i32 = arith.constant 0 : i32
    %c0_i32_0 = arith.constant 0 : i32
    %c0_i32_1 = arith.constant 0 : i32
    return %c0_i32, %c0_i32_0 : i32, i32
  }
  func.func @transform_2(%arg0: i32) -> (i32, i32) {
    %c0_i32 = arith.constant 0 : i32
    %c0_i32_0 = arith.constant 0 : i32
    %c0_i32_1 = arith.constant 0 : i32
    return %c0_i32, %c0_i32_0 : i32, i32
  }
  func.func @transform_3(%arg0: i32) -> (i32, i32) {
    %c0_i32 = arith.constant 0 : i32
    %c0_i32_0 = arith.constant 0 : i32
    return %arg0, %c0_i32 : i32, i32
  }
}

</mosaic_0001>

<bundles_post_ra>
// kernel: tpu_custom_call.1
= control target key start
LH: loop header
LB: loop body
LE: loop exit
PB: predicated region body
PF: predicated region fallthrough
CT: control target
= control target key end

     0   :  { %8 = vsyncpa [#allocation3], 0  ;;  %s202_s0 = inlined_call_operand.hbm [shape: f32[4,4], index: 0, kind: input, shape index: {}]   ;;  %s203_s1 = inlined_call_operand.vmem [shape: f32[1,128], index: 1, kind: input, shape index: {}]   ;;  %s204_s2 = inlined_call_operand.vmem [shape: f32[1,128], index: 2, kind: input, shape index: {}]   ;;  %s205_s3 = inlined_call_operand.hbm [shape: f32[4,128], index: 3, kind: output, shape index: {}]  }
   0x1   :  { %9 = vsyncpa [#allocation4], 0  ;;  %s146_s12 = smov [#allocation2]   ;;  %s98_s16 = scalar_lea.hbm %s202_s0, 64 }
   0x2   :  { %s16_s13 = sshll.u32 %s146_s12, 4  ;;  %p99_p0 = scmp.ne.s32.totalorder %s202_s0, %s98_s16  ;;  %s17_s13 = int_to_ptr.vmem [resolvable:$true] %s16_s13 }
   0x3   :  { %p102_p1 = scmp.lt.u32.totalorder %s98_s16, %s202_s0 }
   0x5   :  { %p104_p2 = pnand %p102_p1, %p99_p0 }
   0x7   :  { %107 = shalt.err (!%p104_p2)
}
   0x8   :  { %s108_s21 = scalar_lea.vmem %s17_s13, 64  ;;  %p113_p4 = scmp.lt.s32.totalorder %s17_s13, %s17_s13 }
   0x9   :  { %p109_p3 = scmp.ne.s32.totalorder %s17_s13, %s108_s21  ;;  %p114_p5 = scmp.lt.s32.totalorder %s108_s21, %s108_s21 }
   0xb   :  { %p115_p6 = por %p114_p5, %p113_p4 }
   0xd   :  { %p116_p7 = pnand %p115_p6, %p109_p3 }
   0xf   :  { %119 = shalt.err (!%p116_p7)
}
  0x10   :  { %19 = dma.hbm_to_vmem [thread:$0]  %s202_s0, 64, %s17_s13, [#allocation3]  }
  0x11   :  { %142 = dma.done.wait [#allocation3], 64  }
  0x12   :  { %143 = vsyncadd [#allocation3], 4294967232  ;;  %v147_v0 = vmov 0   ;;  %v148_v1 = vmov 2   ;;  %v27_v2 = vld [vmem:[#allocation2] sm:$0xf]  ;;  %v33_v5 = vlaneseq }
  0x13   :  { %93 = vset.pattern.permute.xlu0 %v147_v0  ;;  %95 = vset.pattern.permute.xlu1 %v148_v1  ;;  %v149_v3 = vmov 1   ;;  %v150_v4 = vmov 3   ;;  %v85_v12 = vld [vmem:[%s203_s1] ss:$0 sm:$0xff]  ;;  %s151_s27 = smov [#allocation5]  }
  0x14   :  { %30 = vperm.xlu0 %93, %v27_v2   ;;  %43 = vperm.xlu1 %95, %v27_v2   ;;  %v34_v6 = vand.u32 127, %v33_v5  ;;  %v86_v15 = vld [vmem:[%s204_s2] ss:$0 sm:$0xff]  ;;  %s76_s28 = sshll.u32 %s151_s27, 4  ;;  %s77_s28 = int_to_ptr.vmem [resolvable:$true] %s76_s28 }
  0x15   :  { %s120_s29 = scalar_lea.vmem %s77_s28, 64  ;;  %p125_p9 = scmp.lt.s32.totalorder %s77_s28, %s77_s28 }
  0x16   :  { %vm35_vm0 = vcmp.ge.s32.totalorder %v34_v6, 32  ;;  %vm41_vm1 = vcmp.ge.s32.totalorder %v34_v6, 64  ;;  %vm47_vm2 = vcmp.ge.s32.totalorder %v34_v6, 96  ;;  %p121_p8 = scmp.ne.s32.totalorder %s77_s28, %s120_s29  ;;  %p126_p10 = scmp.lt.s32.totalorder %s120_s29, %s120_s29 }
  0x18   :  { %94 = vset.pattern.permute.xlu0 %v149_v3  ;;  %96 = vset.pattern.permute.xlu1 %v150_v4  ;;  %p127_p11 = por %p126_p10, %p125_p9 }
  0x19   :  { %37 = vperm.xlu0 %94, %v27_v2   ;;  %49 = vperm.xlu1 %96, %v27_v2  }
  0x1a   :  { %p128_p12 = pnand %p127_p11, %p121_p8 }
  0x1d   :  { %97 = vset.pattern.permute.xlu0 %v150_v4 }
  0x93   :  { %v31_v7 = vpop.permute.xlu0 %30  ;;  %v44_v8 = vpop.permute.xlu1 %43 }
  0x98   :  { %v38_v9 = vpop.permute.xlu0 %37  ;;  %v50_v10 = vpop.permute.xlu1 %49 }
  0x99   :  { %v40_v11 = vsel %vm35_vm0, %v38_v9, %v31_v7 }
  0x9a   :  { %v46_v13 = vsel %vm41_vm1, %v44_v8, %v40_v11 }
  0x9b   :  { %v52_v14 = vsel %vm47_vm2, %v50_v10, %v46_v13 }
  0x9c   :  { %v60_v16 = vmul.f32 %v85_v12, %v52_v14 }
  0x9e   :  { %v68_v17 = vadd.f32 %v86_v15, %v60_v16 }
  0xa0   :  { %69 = vst [vmem:[#allocation5] sm:$0xf] %v68_v17 }
  0xa1   :  { %131 = shalt.err (!%p128_p12)
}
  0xa2   :  { %s132_s4 = scalar_lea.hbm %s205_s3, 64 }
  0xa3   :  { %p133_p13 = scmp.ne.s32.totalorder %s205_s3, %s132_s4  ;;  %p136_p0 = scmp.lt.u32.totalorder %s132_s4, %s205_s3 }
  0xa5   :  { %p138_p1 = pnand %p136_p0, %p133_p13 }
  0xa7   :  { %141 = shalt.err (!%p138_p1)
}
  0xa8   :  { %79 = dma.vmem_to_hbm [thread:$0]  %s77_s28, 64, %s205_s3, [#allocation4]  }
  0xa9   :  { %144 = dma.done.wait [#allocation4], 64  }
  0xaa   :  { %145 = vsyncadd [#allocation4], 4294967232 }
  0xab   :  { %83 = vsyncpa [#allocation3], 1 }
  0xac   :  { %84 = vsyncpa [#allocation4], 1 }

</bundles_post_ra>
